<compile_context>
chip_gen: v6e
topology: v6e:2x2x1
jax: 0.10.0
libtpu: 0.0.40
codegen_flags: <defaults>
</compile_context>

<pallas_src>
import math
import functools

import jax
import jax.numpy as jnp
from jax.experimental import pallas as pl
from jax.experimental.pallas import tpu as pltpu


def _cdiv(a, b):
    return -(-a // b)


def _zero_softmax_kernel(x_ref, o_ref, *, dim, eps):
    x = x_ref[...].astype(jnp.float32)
    e = jnp.exp(x) - 1.0
    x_exp = e * e
    s = jnp.sum(x_exp, axis=dim, keepdims=True)
    inv = pl.reciprocal(s + eps, approx=True)   # EUP vrcp; VPU slot stays free
    o_ref[...] = (x_exp * inv).astype(o_ref.dtype)


def _vmem_budget(itemsize):
    """Per-generation scoped-VMEM limit and max block element count."""
    try:
        cap = int(pltpu.get_tpu_info().vmem_capacity_bytes)
    except Exception:
        cap = 64 * 1024 * 1024          # conservative (v7x-sized) fallback
    # Explicit limit well above the 16/32 MiB scoped defaults, <= physical.
    vmem_limit = max(16 * 1024 * 1024, (cap * 3) // 4)
    # Live bytes per block element: double-buffered in + out in the I/O dtype
    # plus ~3 f32 temporaries (x, (exp-1)^2, scaled result); keep 2x headroom.
    per_elem = 4 * itemsize + 12
    max_elems = (vmem_limit // 2) // per_elem
    # ~4 MiB f32 blocks already sit on the HBM roofline plateau; bigger buys
    # nothing on any generation and risks v7x's 64 MiB VMEM.
    max_elems = min(max_elems, 1024 * 1024)
    return vmem_limit, max(max_elems, 8 * 128)


def _choose_block(shape, dim, max_elems):
    """Block = full reduce axis + full minor dims; fold leading axes to budget."""
    n = len(shape)
    block = list(shape)

    def elems(b):
        return math.prod(b)

    # 1) Shrink leading (non-minor, non-reduce) axes, outermost first, keeping
    #    inner axes full so DMAs stay long and contiguous.
    for a in range(n - 2):
        if a == dim or elems(block) <= max_elems:
            continue
        rest = elems(block) // block[a]
        block[a] = max(1, min(block[a], max_elems // max(rest, 1)))

    # 2) Last resort: tile the minor axes (lane in 128s, sublane in 8s) when
    #    they are not the reduce axis.
    if elems(block) > max_elems and (n - 1) != dim and block[n - 1] > 128:
        rest = elems(block) // block[n - 1]
        t = (max_elems // max(rest, 1)) // 128 * 128
        block[n - 1] = max(128, min(block[n - 1], t))
    if elems(block) > max_elems and (n - 2) != dim and block[n - 2] > 8:
        rest = elems(block) // block[n - 2]
        t = (max_elems // max(rest, 1)) // 8 * 8
        block[n - 2] = max(8, min(block[n - 2], t))
    return block


def _ensure_multi_step(shape, dim, block):
    """Make sure the parallel grid has >= 2 steps so both v7x TCs get work."""
    n = len(shape)
    if math.prod(_cdiv(shape[a], block[a]) for a in range(n)) >= 2:
        return block
    # Prefer splitting a leading non-reduced axis.
    for a in range(n - 2):
        if a != dim and block[a] >= 2:
            block[a] = _cdiv(block[a], 2)
            return block
    # Then the second-minor axis (8-aligned), then the lane axis (128-aligned).
    a = n - 2
    if a >= 0 and a != dim and block[a] >= 16:
        half = _cdiv(block[a], 2)
        new = max(8, ((half + 7) // 8) * 8)
        if new < block[a]:
            block[a] = new
            return block
    a = n - 1
    if a != dim and block[a] >= 256:
        half = _cdiv(block[a], 2)
        new = max(128, ((half + 127) // 128) * 128)
        if new < block[a]:
            block[a] = new
    return block


def zero_softmax(x, dim=0, eps=1e-5):
    """Pallas implementation of ZeroSoftmax.forward(x, dim, eps)."""
    if x.ndim == 0:
        raise ValueError("zero_softmax requires at least a 1-D input")
    orig_shape = x.shape
    dim = dim % x.ndim
    # Guarantee rank >= 2 (leading unit dims are layout-free).
    added = 0
    while x.ndim < 2:
        x = x[None]
        added += 1
    dim = dim + added

    shape = x.shape
    n = x.ndim
    eps = float(eps)
    itemsize = jnp.dtype(x.dtype).itemsize

    vmem_limit, max_elems = _vmem_budget(itemsize)
    block = _choose_block(shape, dim, max_elems)
    block = _ensure_multi_step(shape, dim, block)
    grid = tuple(_cdiv(shape[a], block[a]) for a in range(n))

    # Grid rank == array rank, so the index map is the identity: block index
    # along each axis is the grid index along that axis.
    spec = pl.BlockSpec(tuple(block), lambda *idx: idx)

    out = pl.pallas_call(
        functools.partial(_zero_softmax_kernel, dim=dim, eps=eps),
        out_shape=jax.ShapeDtypeStruct(shape, x.dtype),
        grid=grid,
        in_specs=[spec],
        out_specs=spec,
        compiler_params=pltpu.CompilerParams(
            dimension_semantics=("parallel",) * n,
            vmem_limit_bytes=int(vmem_limit)),
    )(x)
    return out.reshape(orig_shape)


def _zero_softmax_ref(x, dim=0, eps=1e-5):
    x_exp = jnp.square(jnp.exp(x) - 1.0)
    x_exp_sum = jnp.sum(x_exp, axis=dim, keepdims=True)
    return x_exp / (x_exp_sum + eps)


if __name__ == "__main__":
    key = jax.random.PRNGKey(0)
    # NCHW-like input, same convention as the PyTorch module would receive.
    x = jax.random.normal(key, (2, 4, 16, 16), dtype=jnp.float32)

    # Default path (dim=0): reduce over the leading axis, original layout kept.
    out = jax.block_until_ready(zero_softmax(x, dim=0, eps=1e-5))
    ref = _zero_softmax_ref(x, dim=0, eps=1e-5)
    assert out.shape == x.shape
    # approx=True reciprocal => loosened tolerance (review correctness note).
    assert jnp.allclose(out, ref, atol=3e-3, rtol=3e-3)

    # Last-axis (lane-reduction) path.
    out_last = jax.block_until_ready(zero_softmax(x, dim=-1, eps=1e-5))
    ref_last = _zero_softmax_ref(x, dim=-1, eps=1e-5)
    assert jnp.allclose(out_last, ref_last, atol=3e-3, rtol=3e-3)

    print("KERNEL_OK")
</pallas_src>

<mosaic_0001>
module attributes {stable_mosaic.version = 11 : i64} {
  func.func @_zero_softmax_kernel(%arg0: i32, %arg1: i32, %arg2: i32, %arg3: i32, %arg4: memref<2x2x16x16xf32, #tpu.memory_space<vmem>>, %arg5: memref<2x2x16x16xf32, #tpu.memory_space<vmem>>) attributes {dimension_semantics = [#tpu.dimension_semantics<parallel>, #tpu.dimension_semantics<parallel>, #tpu.dimension_semantics<parallel>, #tpu.dimension_semantics<parallel>], iteration_bounds = array<i64: 1, 2, 1, 1>, scalar_prefetch = 0 : i64, scratch_operands = 0 : i64, tpu.core_type = #tpu.core_type<tc>, window_params = [{transform_indices = @transform_0, window_bounds = array<i64: 2, 2, 16, 16>}, {transform_indices = @transform_1, window_bounds = array<i64: 2, 2, 16, 16>}]} {
    %c0 = arith.constant 0 : index
    %c0_0 = arith.constant 0 : index
    %c0_1 = arith.constant 0 : index
    %c0_2 = arith.constant 0 : index
    %0 = vector.load %arg4[%c0, %c0_0, %c0_1, %c0_2] : memref<2x2x16x16xf32, #tpu.memory_space<vmem>>, vector<2x2x16x16xf32>
    %1 = math.exp %0 : vector<2x2x16x16xf32>
    %cst = arith.constant 1.000000e+00 : f32
    %2 = vector.broadcast %cst : f32 to vector<2x2x16x16xf32>
    %3 = arith.subf %1, %2 : vector<2x2x16x16xf32>
    %4 = arith.mulf %3, %3 : vector<2x2x16x16xf32>
    %cst_3 = arith.constant dense<0.000000e+00> : vector<2x16x16xf32>
    %5 = vector.multi_reduction <add>, %4, %cst_3 [0] : vector<2x2x16x16xf32> to vector<2x16x16xf32>
    %6 = vector.shape_cast %5 : vector<2x16x16xf32> to vector<1x2x16x16xf32>
    %cst_4 = arith.constant 9.99999974E-6 : f32
    %7 = vector.broadcast %cst_4 : f32 to vector<1x2x16x16xf32>
    %8 = arith.addf %6, %7 : vector<1x2x16x16xf32>
    %9 = tpu.reciprocal %8 {approx = true} : vector<1x2x16x16xf32> -> vector<1x2x16x16xf32>
    %10 = vector.broadcast %9 : vector<1x2x16x16xf32> to vector<2x2x16x16xf32>
    %11 = arith.mulf %4, %10 : vector<2x2x16x16xf32>
    %c0_5 = arith.constant 0 : index
    %c0_6 = arith.constant 0 : index
    %c0_7 = arith.constant 0 : index
    %c0_8 = arith.constant 0 : index
    %12 = vector.load %arg5[%c0_5, %c0_6, %c0_7, %c0_8] : memref<2x2x16x16xf32, #tpu.memory_space<vmem>>, vector<2x2x16x16xf32>
    tpu.vector_store %arg5[%c0_5, %c0_6, %c0_7, %c0_8], %11 {strides = array<i32>} : memref<2x2x16x16xf32, #tpu.memory_space<vmem>>, vector<2x2x16x16xf32>,
    return
  }
  func.func @transform_0(%arg0: i32, %arg1: i32, %arg2: i32, %arg3: i32) -> (i32, i32, i32, i32) {
    %c0_i32 = arith.constant 0 : i32
    return %arg0, %arg1, %arg2, %arg3 : i32, i32, i32, i32
  }
  func.func @transform_1(%arg0: i32, %arg1: i32, %arg2: i32, %arg3: i32) -> (i32, i32, i32, i32) {
    %c0_i32 = arith.constant 0 : i32
    return %arg0, %arg1, %arg2, %arg3 : i32, i32, i32, i32
  }
}

</mosaic_0001>

<bundles_post_ra>
// kernel: tpu_custom_call.1
= control target key start
LH: loop header
LB: loop body
LE: loop exit
PB: predicated region body
PF: predicated region fallthrough
CT: control target
= control target key end

     0   :  { %6 = vsyncpa [#allocation3], 0  ;;  %s807_s0 = inlined_call_operand.hbm [shape: f32[2,4,16,16], index: 0, kind: input, shape index: {}]   ;;  %s808_s1 = inlined_call_operand.hbm [shape: f32[2,4,16,16], index: 1, kind: output, shape index: {}]  }
   0x1   :  { %8 = vsyncpa [#allocation3 + $0x1], 0 }
   0x2   :  { %9 = vsyncpa [#allocation4], 0 }
   0x3   :  { %11 = vsyncpa [#allocation4 + $0x1], 0  ;;  %s648_s6 = smov 0   ;;  %s650_s7 = smov 0  }
   0x4   :  { %s652_s8 = smov 0   ;;  %s654_s9 = smov 0  }
   0x5   :  { %s656_s10 = smov 0   ;;  %s658_s11 = smov 0  }
   0x6 LB: > { %s431_s12 = sadd.s32 4294967295, %s623_s11   ;;  %s432_s13 = sadd.s32 4294967294, %s623_s11   ;;  %s623_s11 = sphi %s658_s11, %s17_s11   ;;  %s619_s10 = sphi %s656_s10, %s817_s10   ;;  %s615_s9 = sphi %s654_s9, %s816_s9   ;;  %s611_s8 = sphi %s652_s8, %s815_s8   ;;  %s607_s7 = sphi %s650_s7, %s814_s7   ;;  %s603_s6 = sphi %s648_s6, %s813_s6  }
   0x7   : > { %s39_s14 = sadd.s32 1, %s619_s10  ;;  %s56_s15 = sadd.s32 1, %s611_s8 }
   0x8   : > { %p41_p0 = scmp.ge.s32.totalorder %s39_s14, 2  ;;  %p63_p1 = scmp.ne.s32.totalorder %s611_s8, %s607_s7 }
   0x9   : > { %p64_p2 = scmp.eq.s32.totalorder %s623_s11, 0  ;;  %p69_p3 = scmp.ne.s32.totalorder %s607_s7, %s603_s6 }
   0xa   : > { %s819_s14 = smov (%p41_p0, %s39_s14), 0  ;;  %p70_p5 = scmp.eq.s32.totalorder %s431_s12, 0 }
   0xb   : > { %p689_p4 = por %p64_p2, %p63_p1  ;;  %s48_s17 = ssub.s32 %s619_s10, %s819_s14 }
   0xc   : > { %p99_p6 = scmp.eq.s32.totalorder %s431_s12, 1  ;;  %p54_p7 = scmp.eq.s32.totalorder %s48_s17, 0 }
   0xd   : > { %p695_p8 = por %p70_p5, %p69_p3  ;;  %p105_p10 = scmp.eq.s32.totalorder %s432_s13, 1 }
   0xe   : > { %p699_p9 = por %p99_p6, %p63_p1  ;;  %p434_p12 = scmp.ge.s32.totalorder %s623_s11, 2 }
   0xf   : > { %s704_s20 = scalar_select %p54_p7, %s611_s8, %s56_s15  }
  0x10   : > { %p706_p11 = por %p105_p10, %p69_p3  ;;  %121 = sbr.rel (%p434_p12) target bundleno = 34 (0x22), region = 16 }
  0x15   : > { %s125_s22 = sand.u32 1, %s611_s8   ;;  %s459_s23 = sshll.u32 %s619_s10, 9 }
  0x16   : > { %s435_s24 = sshll.u32 %s125_s22, 6  ;;  %s142_s27 = scalar_lea.hbm %s807_s0, %s459_s23 }
  0x17   : > { %s462_s28 = scalar_select %p689_p4, [#allocation0], [#allocation10] }
  0x18   : > { %s129_s29 = scalar_lea.vmem [#allocation2], %s435_s24  ;;  %s625_s3 = smov 1024  }
  0x19   : > { %s155_s30 = sshll.u32 %s129_s29, 4  ;;  %s147_s2 = sld [smem:[%s462_s28]]   ;;  %s156_s30 = int_to_ptr.vmem [resolvable:$true] %s155_s30 }
  0x1a   : > { %463 = sst [smem:[#allocation7]] (%p689_p4), %s625_s3  ;;  %s626_s4 = smov 512  }
  0x1b   : > { %464 = sst [smem:[#allocation7 + $0x1]] (%p689_p4), %s626_s4  ;;  %s627_s5 = smov 4  }
  0x1c   : > { %465 = sst [smem:[#allocation7 + $0x2]] (%p689_p4), %s627_s5  ;;  %s628_s12 = smov 128  }
  0x1d   : > { %466 = sst [smem:[#allocation7 + $0x3]] (%p689_p4), %s628_s12  ;;  %s629_s15 = smov 8  }
  0x1e   : > { %467 = sst [smem:[#allocation7 + $0x4]] (%p689_p4), %s628_s12  ;;  %s126_s23 = scalar_lea.sflag [#allocation3], %s125_s22 }
  0x1f   : > { %s439_s13 = sshll.u32 %s147_s2, 26  ;;  %468 = sst [smem:[#allocation7 + $0x5]] (%p689_p4), %s629_s15 }
  0x20   : > { %s440_s17 = sadd.s32 134217728, %s439_s13  ;;  %s630_s24 = smov 131072  }
  0x21   : > { %469 = dma.general (%p689_p4), %s142_s27, 1024, %s156_s30, %s126_s23, %s630_s24, [#allocation7], %s440_s17, 0  }
  0x22 PF: > { %p441_p13 = scmp.ge.s32.totalorder %s623_s11, 1  ;;  %p176_p0 = scmp.lt.s32.totalorder %s623_s11, 3 }
  0x24   : > { %p177_p1 = pnand %p441_p13, %p176_p0 }
  0x25   : > { %s737_s25 = sand.u32 (!%p177_p1), 1, %s607_s7  }
  0x26   : > { %180 = sbr.rel (%p177_p1) target bundleno = 103 (0x67), region = 24  ;;  %s442_s26 = sshll.u32 (!%p177_p1), %s737_s25, 6 }
  0x27   : > { %s183_s28 = scalar_lea.sflag (!%p177_p1), [#allocation3], %s737_s25  ;;  %s186_s22 = scalar_lea.vmem (!%p177_p1), [#allocation2], %s442_s26 }
  0x2b   : > { %594 = dma.done.wait (%p695_p8), %s183_s28, 1024  }
  0x2c   : > { %596 = vsyncadd (%p695_p8), %s183_s28, 4294966272  ;;  %v211_v0 = vld [vmem:[%s186_s22] sm:$0xff]  ;;  %v212_v2 = vld [vmem:[%s186_s22 + $0x8] sm:$0xff]  ;;  %vm251_vm0 = vcmask 130048   ;;  %s204_s16 = scalar_lea.vmem [#allocation5], %s442_s26  ;;  %s289_s18 = scalar_lea.sflag [#allocation4], %s737_s25 }
  0x2d   : > { %v215_v1 = vld [vmem:[%s186_s22 + $0x20] sm:$0xff]  ;;  %v219_v3 = vmul.f32 1.442695, %v211_v0  ;;  %v216_v5 = vld [vmem:[%s186_s22 + $0x28] sm:$0xff]  ;;  %v213_v6 = vld [vmem:[%s186_s22 + $0x10] sm:$0xff] }
  0x2e   : > { %v227_v4 = vmul.f32 1.442695, %v215_v1  ;;  %v221_v7 = vmul.f32 1.442695, %v212_v2  ;;  %v229_v8 = vmul.f32 1.442695, %v216_v5 }
  0x2f   : > { %v217_v9 = vld [vmem:[%s186_s22 + $0x30] sm:$0xff]  ;;  %v214_v10 = vld [vmem:[%s186_s22 + $0x18] sm:$0xff]  ;;  %545 = vpow2.f32 %v219_v3  ;;  %v223_v11 = vmul.f32 1.442695, %v213_v6 }
  0x30   : > { %v218_v12 = vld [vmem:[%s186_s22 + $0x38] sm:$0xff]  ;;  %547 = vpow2.f32 %v227_v4  ;;  %v231_v13 = vmul.f32 1.442695, %v217_v9  ;;  %v225_v14 = vmul.f32 1.442695, %v214_v10 }
  0x31   : > { %549 = vpow2.f32 %v221_v7  ;;  %v233_v15 = vmul.f32 1.442695, %v218_v12 }
  0x32   : > { %551 = vpow2.f32 %v229_v8 }
  0x33   : > { %553 = vpow2.f32 %v223_v11 }
  0x34   : > { %555 = vpow2.f32 %v231_v13 }
  0x35   : > { %557 = vpow2.f32 %v225_v14 }
  0x36   : > { %559 = vpow2.f32 %v233_v15 }
  0x3c   : > { %v546_v16 = vpop.eup %545 }
  0x3d   : > { %v548_v17 = vpop.eup %547  ;;  %v444_v18 = vadd.f32 -1.0, %v546_v16 }
  0x3e   : > { %v550_v19 = vpop.eup %549  ;;  %v448_v20 = vadd.f32 -1.0, %v548_v17 }
  0x3f   : > { %v552_v21 = vpop.eup %551  ;;  %v243_v22 = vmul.f32 %v444_v18, %v444_v18  ;;  %v445_v23 = vadd.f32 -1.0, %v550_v19 }
  0x40   : > { %v554_v24 = vpop.eup %553  ;;  %v247_v25 = vmul.f32 %v448_v20, %v448_v20  ;;  %v449_v26 = vadd.f32 -1.0, %v552_v21 }
  0x41   : > { %v556_v27 = vpop.eup %555  ;;  %v252_v28 = vsel %vm251_vm0, %v243_v22, 0.0  ;;  %v244_v29 = vmul.f32 %v445_v23, %v445_v23  ;;  %v446_v30 = vadd.f32 -1.0, %v554_v24 }
  0x42   : > { %v558_v31 = vpop.eup %557  ;;  %v253_v32 = vsel %vm251_vm0, %v247_v25, 0.0  ;;  %v248_v33 = vmul.f32 %v449_v26, %v449_v26  ;;  %v450_v34 = vadd.f32 -1.0, %v556_v27 }
  0x43   : > { %v560_v35 = vpop.eup %559  ;;  %v254_v36 = vadd.f32 %v253_v32, %v252_v28  ;;  %v255_v37 = vsel %vm251_vm0, %v244_v29, 0.0  ;;  %v245_v38 = vmul.f32 %v446_v30, %v446_v30  ;;  %v447_v39 = vadd.f32 -1.0, %v558_v31 }
  0x44   : > { %v256_v40 = vsel %vm251_vm0, %v248_v33, 0.0  ;;  %v249_v41 = vmul.f32 %v450_v34, %v450_v34  ;;  %v451_v42 = vadd.f32 -1.0, %v560_v35 }
  0x45   : > { %v264_v43 = vadd.f32 1e-05, %v254_v36  ;;  %v257_v44 = vadd.f32 %v256_v40, %v255_v37  ;;  %v258_v45 = vsel %vm251_vm0, %v245_v38, 0.0  ;;  %v246_v46 = vmul.f32 %v447_v39, %v447_v39 }
  0x46   : > { %v259_v47 = vsel %vm251_vm0, %v249_v41, 0.0  ;;  %v250_v48 = vmul.f32 %v451_v42, %v451_v42 }
  0x47   : > { %561 = vrcp.f32 %v264_v43  ;;  %v265_v49 = vadd.f32 1e-05, %v257_v44  ;;  %v260_v50 = vadd.f32 %v259_v47, %v258_v45  ;;  %v261_v51 = vsel %vm251_vm0, %v246_v46, 0.0 }
  0x48   : > { %v262_v52 = vsel %vm251_vm0, %v250_v48, 0.0 }
  0x49   : > { %563 = vrcp.f32 %v265_v49  ;;  %v266_v53 = vadd.f32 1e-05, %v260_v50  ;;  %v263_v54 = vadd.f32 %v262_v52, %v261_v51 }
  0x4b   : > { %565 = vrcp.f32 %v266_v53  ;;  %v267_v55 = vadd.f32 1e-05, %v263_v54 }
  0x4d   : > { %567 = vrcp.f32 %v267_v55 }
  0x54   : > { %v562_v56 = vpop.eup %561 }
  0x55   : > { %v272_v57 = vmul.f32 %v562_v56, %v243_v22  ;;  %v276_v58 = vmul.f32 %v562_v56, %v247_v25 }
  0x56   : > { %v564_v59 = vpop.eup %563 }
  0x57   : > { %280 = vst.msk [vmem:[%s204_s16] sm:$0xff] %vm251_vm0, %v272_v57  ;;  %v273_v60 = vmul.f32 %v564_v59, %v244_v29  ;;  %284 = vst.msk [vmem:[%s204_s16 + $0x20] sm:$0xff] %vm251_vm0, %v276_v58  ;;  %v277_v61 = vmul.f32 %v564_v59, %v248_v33 }
  0x58   : > { %v566_v62 = vpop.eup %565 }
  0x59   : > { %281 = vst.msk [vmem:[%s204_s16 + $0x8] sm:$0xff] %vm251_vm0, %v273_v60  ;;  %v274_v63 = vmul.f32 %v566_v62, %v245_v38  ;;  %285 = vst.msk [vmem:[%s204_s16 + $0x28] sm:$0xff] %vm251_vm0, %v277_v61  ;;  %v278_v0 = vmul.f32 %v566_v62, %v249_v41 }
  0x5a   : > { %v568_v1 = vpop.eup %567 }
  0x5b   : > { %282 = vst.msk [vmem:[%s204_s16 + $0x10] sm:$0xff] %vm251_vm0, %v274_v63  ;;  %v275_v2 = vmul.f32 %v568_v1, %v246_v46  ;;  %286 = vst.msk [vmem:[%s204_s16 + $0x30] sm:$0xff] %vm251_vm0, %v278_v0  ;;  %v279_v3 = vmul.f32 %v568_v1, %v250_v48 }
  0x5d   : > { %283 = vst.msk [vmem:[%s204_s16 + $0x18] sm:$0xff] %vm251_vm0, %v275_v2  ;;  %287 = vst.msk [vmem:[%s204_s16 + $0x38] sm:$0xff] %vm251_vm0, %v279_v3 }
  0x5e   : > { %s461_s27 = sshll.u32 %s615_s9, 9  ;;  %s319_s29 = sshll.u32 %s204_s16, 4  ;;  %s320_s29 = int_to_ptr.vmem [resolvable:$true] %s319_s29 }
  0x5f   : > { %s308_s3 = scalar_lea.hbm %s808_s1, %s461_s27  ;;  %s631_s4 = smov 512  }
  0x60   : > { %471 = sst [smem:[#allocation9]] (%p699_p9), %s631_s4  ;;  %s632_s5 = smov 1024  }
  0x61   : > { %472 = sst [smem:[#allocation9 + $0x1]] (%p699_p9), %s632_s5  ;;  %s633_s12 = smov 4  }
  0x62   : > { %473 = sst [smem:[#allocation9 + $0x2]] (%p699_p9), %s633_s12  ;;  %s634_s13 = smov 128  }
  0x63   : > { %474 = sst [smem:[#allocation9 + $0x3]] (%p699_p9), %s634_s13  ;;  %s635_s9 = smov 8  }
  0x64   : > { %475 = sst [smem:[#allocation9 + $0x4]] (%p699_p9), %s634_s13  ;;  %s636_s15 = smov 131072  }
  0x65   : > { %476 = sst [smem:[#allocation9 + $0x5]] (%p699_p9), %s635_s9  ;;  %s637_s17 = smov 0  }
  0x66   : > { %477 = dma.general (%p699_p9), %s320_s29, 1024, %s308_s3, %s289_s18, %s636_s15, [#allocation9], %s637_s17, 0  }
  0x67 PF: > { %s347_s23 = sand.u32 1, %s603_s6   ;;  %p480_p2 = pnand %p434_p12, %p706_p11 }
  0x68   : > { %s348_s24 = scalar_lea.sflag [#allocation4], %s347_s23 }
  0x69   : > { %p481_p3 = pneg %p480_p2 }
  0x6b   : > { %598 = dma.done.wait (%p481_p3), %s348_s24, 1024  }
  0x6c   : > { %600 = vsyncadd (%p481_p3), %s348_s24, 4294966272  ;;  %s17_s11 = sadd.s32 1, %s623_s11   ;;  %s813_s6 = smov %s607_s7 }
  0x6d   : > { %p14_p4 = scmp.ge.s32.totalorder %s17_s11, 4   ;;  %s814_s7 = smov %s611_s8 }
  0x6e   : > { %s815_s8 = smov %s704_s20  ;;  %s816_s9 = smov %s619_s10 }
  0x6f   : > { %s817_s10 = smov %s819_s14  ;;  %16 = sbr.rel (!%p14_p4) target bundleno = 6 (0x6), region = 79 }
  0x74   :  { %353 = vsyncpa [#allocation3], 1 }
  0x75   :  { %355 = vsyncpa [#allocation3 + $0x1], 1 }
  0x76   :  { %356 = vsyncpa [#allocation4], 1 }
  0x77   :  { %358 = vsyncpa [#allocation4 + $0x1], 1 }

</bundles_post_ra>
